<compile_context>
chip_gen: v6e
topology: v6e:2x2x1
jax: 0.10.0
libtpu: 0.0.40
codegen_flags: <defaults>
</compile_context>

<pallas_src>
import functools

import jax
import jax.numpy as jnp
from jax.experimental import pallas as pl
from jax.experimental.pallas import tpu as pltpu


def channel_attention_kernel(x_ref, w1_ref, b1_ref, w2_ref, b2_ref,
                             o_ref, acc_ref, *, inv_hw, hw_total, tile_hw,
                             tile_b, needs_mask):
    """Grid = (num_b_tiles, num_hw_tiles).  x_ref block: (TILE_B, C, TILE_HW).

    acc_ref (VMEM scratch, (2*TILE_B, C) f32): rows [0:TILE_B] hold the
    running spatial sum, rows [TILE_B:2*TILE_B] the running spatial max.
    The shared MLP + sigmoid run once per batch tile at the last HW tile,
    with the avg and max rows stacked into ONE (2*TILE_B, C) matmul; only the
    (TILE_B, 1, C) attention rows are written out.
    """
    k = pl.program_id(1)

    # Cast to f32 before reducing (required for bf16 inputs; no-op for f32).
    xf = x_ref[...].astype(jnp.float32)               # (TILE_B, C, TILE_HW)

    if needs_mask:
        # HW is not a multiple of TILE_HW: mask out-of-range lanes on the
        # (padded, garbage-filled) tail tile.  0 for the sum path, -inf for
        # the max path.  Cheap VALU work; the kernel is DMA bound.
        col = jax.lax.broadcasted_iota(jnp.int32, xf.shape, 2)
        valid = (k * tile_hw + col) < hw_total
        tile_sum = jnp.sum(jnp.where(valid, xf, 0.0), axis=-1)        # (TB, C)
        tile_max = jnp.max(jnp.where(valid, xf, -jnp.inf), axis=-1)   # (TB, C)
    else:
        tile_sum = jnp.sum(xf, axis=-1)                               # (TB, C)
        tile_max = jnp.max(xf, axis=-1)                               # (TB, C)

    @pl.when(k == 0)
    def _():
        acc_ref[0:tile_b, :] = tile_sum
        acc_ref[tile_b:2 * tile_b, :] = tile_max

    @pl.when(k > 0)
    def _():
        acc_ref[0:tile_b, :] = acc_ref[0:tile_b, :] + tile_sum
        acc_ref[tile_b:2 * tile_b, :] = jnp.maximum(
            acc_ref[tile_b:2 * tile_b, :], tile_max)

    @pl.when(k == pl.num_programs(1) - 1)
    def _():
        acc = acc_ref[...]                                   # (2*TILE_B, C)
        row = jax.lax.broadcasted_iota(jnp.int32, acc.shape, 0)
        pooled = jnp.where(row < tile_b, acc * inv_hw, acc)  # [avg; max]
        w1 = w1_ref[...].astype(jnp.float32)
        b1 = b1_ref[...].astype(jnp.float32)
        w2 = w2_ref[...].astype(jnp.float32)
        b2 = b2_ref[...].astype(jnp.float32)
        # Shared 2-layer MLP; avg and max rows stacked into one matmul.
        h = jnp.dot(pooled, w1, preferred_element_type=jnp.float32)
        h = jnp.maximum(h + b1, 0.0)                         # ReLU
        att2 = jnp.dot(h, w2, preferred_element_type=jnp.float32) + b2
        att = att2[0:tile_b, :] + att2[tile_b:2 * tile_b, :]  # avg + max
        o_ref[...] = jax.nn.sigmoid(att).reshape(o_ref.shape).astype(o_ref.dtype)


def _round_up(v, m):
    return ((v + m - 1) // m) * m


def _choose_tiling(B, C, HW, itemsize, target_block_bytes):
    """Returns (tile_b, tile_hw, num_hw_tiles, needs_mask).

    Two regimes:
      1. One (C, HW) row fits the target block -> fold TILE_B batch rows per
         grid step (single spatial tile of the full extent, always legal).
      2. Large rows -> one batch row per step, spatial axis tiled in
         multiples of 128 lanes; ceil-div grid with an in-kernel mask when
         HW does not divide.
    VMEM sizes use (8, 128)-padded footprints.
    """
    row_bytes = _round_up(C, 8) * _round_up(HW, 128) * itemsize

    if row_bytes <= target_block_bytes:
        tile_b = max(1, min(B, target_block_bytes // row_bytes))
        if B >= 2:
            # Keep at least 2 batch tiles so v7x can shard across its 2 TCs.
            tile_b = max(1, min(tile_b, B // 2))
        while B % tile_b:          # largest divisor of B not above tile_b
            tile_b -= 1
        return tile_b, HW, 1, False

    lanes = target_block_bytes // (_round_up(C, 8) * itemsize)
    tile_hw = max(128, (lanes // 128) * 128)
    tile_hw = min(tile_hw, _round_up(HW, 128))
    num_hw_tiles = -(-HW // tile_hw)
    needs_mask = (HW % tile_hw) != 0
    return 1, tile_hw, num_hw_tiles, needs_mask


def _estimate_vmem_limit(tile_b, C, tile_hw, mid, x_itemsize):
    """Double-buffered x + weights + output + scratch, padded to (8, 128)."""
    x_block = tile_b * _round_up(C, 8) * _round_up(tile_hw, 128) * x_itemsize
    w_bytes = (_round_up(C, 8) * _round_up(mid, 128)
               + 8 * _round_up(mid, 128)
               + _round_up(mid, 8) * _round_up(C, 128)
               + 8 * _round_up(C, 128)) * 4
    out_block = tile_b * 8 * _round_up(C, 128) * 4
    scratch = _round_up(2 * tile_b, 8) * _round_up(C, 128) * 4
    est = 2 * x_block + 2 * w_bytes + 2 * out_block + scratch
    # Headroom, but stay <= 48 MiB so the same config also fits v7x (64 MiB).
    return max(32 << 20, min(48 << 20, est + (8 << 20)))


def channel_attention(x, w1, b1, w2, b2, *, target_block_bytes=4 << 20,
                      vmem_limit_bytes=None):
    """x: (B, C, H, W) float. Returns the sigmoid channel attention expanded
    to (B, C, H, W) in x.dtype, matching ChannelAttention.forward."""
    B, C, H, W = x.shape
    HW = H * W
    mid = w1.shape[1]
    x_flat = x.reshape(B, C, HW)
    itemsize = jnp.dtype(x.dtype).itemsize

    tile_b, tile_hw, num_hw_tiles, needs_mask = _choose_tiling(
        B, C, HW, itemsize, target_block_bytes)
    num_b_tiles = B // tile_b

    if vmem_limit_bytes is None:
        vmem_limit_bytes = _estimate_vmem_limit(tile_b, C, tile_hw, mid,
                                                itemsize)

    kernel = functools.partial(
        channel_attention_kernel, inv_hw=1.0 / HW, hw_total=HW,
        tile_hw=tile_hw, tile_b=tile_b, needs_mask=needs_mask)

    att = pl.pallas_call(
        kernel,
        out_shape=jax.ShapeDtypeStruct((B, 1, C), x.dtype),
        grid_spec=pltpu.PrefetchScalarGridSpec(
            num_scalar_prefetch=0,
            grid=(num_b_tiles, num_hw_tiles),
            in_specs=[
                # x: one (TILE_B, C, TILE_HW) slab per grid step.
                pl.BlockSpec((tile_b, C, tile_hw), lambda b, k: (b, 0, k)),
                # Weights/biases: constant block index -> DMA'd once and kept
                # resident in VMEM across the whole grid.
                pl.BlockSpec((C, mid), lambda b, k: (0, 0)),
                pl.BlockSpec((1, mid), lambda b, k: (0, 0)),
                pl.BlockSpec((mid, C), lambda b, k: (0, 0)),
                pl.BlockSpec((1, C), lambda b, k: (0, 0)),
            ],
            out_specs=pl.BlockSpec((tile_b, 1, C), lambda b, k: (b, 0, 0)),
            scratch_shapes=[pltpu.VMEM((2 * tile_b, C), jnp.float32)],
        ),
        compiler_params=pltpu.CompilerParams(
            # Batch tiles are independent -> megacore-shard on v7x.
            # HW axis is a running reduction -> arbitrary.
            dimension_semantics=("parallel", "arbitrary"),
            vmem_limit_bytes=vmem_limit_bytes,
        ),
    )(x_flat, w1, b1, w2, b2)

    att = att.reshape(B, C)
    # expand_as(x): broadcast in the wrapper (fuses into any consumer) instead
    # of materializing B*C*HW redundant values from the kernel.
    return jnp.broadcast_to(att[:, :, None, None], (B, C, H, W))


def reference_channel_attention(x, w1, b1, w2, b2):
    """Pure-JAX reference matching the PyTorch forward semantics."""
    B, C, H, W = x.shape
    x_flat = x.reshape(B, C, H * W)
    avg_pool = jnp.mean(x_flat, axis=-1)
    max_pool = jnp.max(x_flat, axis=-1)

    def mlp(p):
        h = jnp.maximum(p @ w1 + b1[0], 0.0)
        return h @ w2 + b2[0]

    att = jax.nn.sigmoid(mlp(avg_pool) + mlp(max_pool))   # (B, C)
    return jnp.broadcast_to(att[:, :, None, None], (B, C, H, W))


def _make_params(key, gate_channels):
    """PyTorch-Linear-style deterministic init; mid = max(C // 16, 2)."""
    mid = max(int(gate_channels * (1.0 / 16.0)), 2)
    k1, k2, k3, k4 = jax.random.split(key, 4)
    bound1 = 1.0 / (gate_channels ** 0.5)
    bound2 = 1.0 / (mid ** 0.5)
    w1 = jax.random.uniform(k1, (gate_channels, mid), jnp.float32, -bound1, bound1)
    b1 = jax.random.uniform(k2, (1, mid), jnp.float32, -bound1, bound1)
    w2 = jax.random.uniform(k3, (mid, gate_channels), jnp.float32, -bound2, bound2)
    b2 = jax.random.uniform(k4, (1, gate_channels), jnp.float32, -bound2, bound2)
    return w1, b1, w2, b2


def _run_case(key, shape, dtype, target_block_bytes, atol):
    B, C, H, W = shape
    kx, kp = jax.random.split(key)
    x = jax.random.normal(kx, shape, dtype=jnp.float32).astype(dtype)
    w1, b1, w2, b2 = _make_params(kp, C)
    out = jax.block_until_ready(
        channel_attention(x, w1, b1, w2, b2,
                          target_block_bytes=target_block_bytes))
    ref = reference_channel_attention(x.astype(jnp.float32), w1, b1, w2, b2)
    assert out.shape == shape, (out.shape, shape)
    assert jnp.allclose(out.astype(jnp.float32), ref, atol=atol, rtol=1e-3), \
        f"mismatch for shape={shape} dtype={dtype}"


if __name__ == "__main__":
    key = jax.random.PRNGKey(0)

    cases = [
        # Small spec shapes: batch-folding regime, single HW tile.
        ((2, 4, 16, 16), jnp.float32, 4 << 20, 1e-5),
        ((2, 8, 64, 64), jnp.float32, 4 << 20, 1e-5),
        # Large row: tiled HW reduction (grid k-axis > 1), exact division.
        ((1, 256, 128, 128), jnp.float32, 4 << 20, 1e-4),
        # HW not a multiple of 128: exercises the masked partial tail tile
        # (small target forces the spatial-tiling regime).
        ((2, 8, 23, 17), jnp.float32, 4 * 1024, 1e-5),
        # bf16 input streamed as-is; f32 accumulation inside the kernel.
        ((2, 16, 32, 32), jnp.bfloat16, 4 << 20, 2e-2),
    ]

    for i, (shape, dtype, target, atol) in enumerate(cases):
        key, sub = jax.random.split(key)
        _run_case(sub, shape, dtype, target, atol)

    print("KERNEL_OK")
</pallas_src>

<mosaic_0001>
module attributes {stable_mosaic.version = 11 : i64} {
  func.func @channel_attention_kernel(%arg0: i32, %arg1: i32, %arg2: memref<1x4x256xf32, #tpu.memory_space<vmem>>, %arg3: memref<4x2xf32, #tpu.memory_space<vmem>>, %arg4: memref<1x2xf32, #tpu.memory_space<vmem>>, %arg5: memref<2x4xf32, #tpu.memory_space<vmem>>, %arg6: memref<1x4xf32, #tpu.memory_space<vmem>>, %arg7: memref<1x1x4xf32, #tpu.memory_space<vmem>>, %arg8: memref<2x4xf32, #tpu.memory_space<vmem>>) attributes {dimension_semantics = [#tpu.dimension_semantics<parallel>, #tpu.dimension_semantics<arbitrary>], iteration_bounds = array<i64: 2, 1>, scalar_prefetch = 0 : i64, scratch_operands = 1 : i64, tpu.core_type = #tpu.core_type<tc>, window_params = [{transform_indices = @transform_0, window_bounds = array<i64: 1, 4, 256>}, {pipeline_mode = #tpu.pipeline_mode<synchronous>, transform_indices = @transform_1, window_bounds = array<i64: 4, 2>}, {pipeline_mode = #tpu.pipeline_mode<synchronous>, transform_indices = @transform_2, window_bounds = array<i64: 1, 2>}, {pipeline_mode = #tpu.pipeline_mode<synchronous>, transform_indices = @transform_3, window_bounds = array<i64: 2, 4>}, {pipeline_mode = #tpu.pipeline_mode<synchronous>, transform_indices = @transform_4, window_bounds = array<i64: 1, 4>}, {transform_indices = @transform_5, window_bounds = array<i64: 1, 1, 4>}]} {
    %c0 = arith.constant 0 : index
    %c0_0 = arith.constant 0 : index
    %c0_1 = arith.constant 0 : index
    %0 = vector.load %arg2[%c0, %c0_0, %c0_1] : memref<1x4x256xf32, #tpu.memory_space<vmem>>, vector<1x4x256xf32>
    %cst = arith.constant dense<0.000000e+00> : vector<1x4xf32>
    %1 = vector.multi_reduction <add>, %0, %cst [2] : vector<1x4x256xf32> to vector<1x4xf32>
    %cst_2 = arith.constant dense<0xFF800000> : vector<1x4xf32>
    %2 = vector.multi_reduction <maximumf>, %0, %cst_2 [2] : vector<1x4x256xf32> to vector<1x4xf32>
    %c0_i32 = arith.constant 0 : i32
    %3 = arith.cmpi eq, %arg1, %c0_i32 : i32
    %4 = arith.extui %3 : i1 to i32
    %c0_i32_3 = arith.constant 0 : i32
    %5 = arith.cmpi ne, %4, %c0_i32_3 : i32
    scf.if %5 {
      %c0_8 = arith.constant 0 : index
      %c0_9 = arith.constant 0 : index
      %12 = vector.load %arg8[%c0_8, %c0_9] : memref<2x4xf32, #tpu.memory_space<vmem>>, vector<1x4xf32>
      tpu.vector_store %arg8[%c0_8, %c0_9], %1 {strides = array<i32>} : memref<2x4xf32, #tpu.memory_space<vmem>>, vector<1x4xf32>,
      %c1 = arith.constant 1 : index
      %c0_10 = arith.constant 0 : index
      %13 = vector.load %arg8[%c1, %c0_10] : memref<2x4xf32, #tpu.memory_space<vmem>>, vector<1x4xf32>
      tpu.vector_store %arg8[%c1, %c0_10], %2 {strides = array<i32>} : memref<2x4xf32, #tpu.memory_space<vmem>>, vector<1x4xf32>,
    } else {
    }
    %c0_i32_4 = arith.constant 0 : i32
    %6 = arith.cmpi sgt, %arg1, %c0_i32_4 : i32
    %7 = arith.extui %6 : i1 to i32
    %c0_i32_5 = arith.constant 0 : i32
    %8 = arith.cmpi ne, %7, %c0_i32_5 : i32
    scf.if %8 {
      %c0_8 = arith.constant 0 : index
      %c0_9 = arith.constant 0 : index
      %12 = vector.load %arg8[%c0_8, %c0_9] : memref<2x4xf32, #tpu.memory_space<vmem>>, vector<1x4xf32>
      %13 = arith.addf %12, %1 : vector<1x4xf32>
      %c0_10 = arith.constant 0 : index
      %c0_11 = arith.constant 0 : index
      %14 = vector.load %arg8[%c0_10, %c0_11] : memref<2x4xf32, #tpu.memory_space<vmem>>, vector<1x4xf32>
      tpu.vector_store %arg8[%c0_10, %c0_11], %13 {strides = array<i32>} : memref<2x4xf32, #tpu.memory_space<vmem>>, vector<1x4xf32>,
      %c1 = arith.constant 1 : index
      %c0_12 = arith.constant 0 : index
      %15 = vector.load %arg8[%c1, %c0_12] : memref<2x4xf32, #tpu.memory_space<vmem>>, vector<1x4xf32>
      %16 = arith.maximumf %15, %2 : vector<1x4xf32>
      %c1_13 = arith.constant 1 : index
      %c0_14 = arith.constant 0 : index
      %17 = vector.load %arg8[%c1_13, %c0_14] : memref<2x4xf32, #tpu.memory_space<vmem>>, vector<1x4xf32>
      tpu.vector_store %arg8[%c1_13, %c0_14], %16 {strides = array<i32>} : memref<2x4xf32, #tpu.memory_space<vmem>>, vector<1x4xf32>,
    } else {
    }
    %c0_i32_6 = arith.constant 0 : i32
    %9 = arith.cmpi eq, %arg1, %c0_i32_6 : i32
    %10 = arith.extui %9 : i1 to i32
    %c0_i32_7 = arith.constant 0 : i32
    %11 = arith.cmpi ne, %10, %c0_i32_7 : i32
    scf.if %11 {
      %c0_8 = arith.constant 0 : index
      %c0_9 = arith.constant 0 : index
      %12 = vector.load %arg8[%c0_8, %c0_9] : memref<2x4xf32, #tpu.memory_space<vmem>>, vector<2x4xf32>
      %13 = tpu.iota {dimensions = array<i32: 0>} : vector<2x4xi32>
      %c1_i32 = arith.constant 1 : i32
      %14 = vector.broadcast %c1_i32 : i32 to vector<2x4xi32>
      %15 = arith.cmpi slt, %13, %14 : vector<2x4xi32>
      %cst_10 = arith.constant 3.906250e-03 : f32
      %16 = vector.broadcast %cst_10 : f32 to vector<2x4xf32>
      %17 = arith.mulf %12, %16 : vector<2x4xf32>
      %18 = arith.select %15, %17, %12 : vector<2x4xi1>, vector<2x4xf32>
      %c0_11 = arith.constant 0 : index
      %c0_12 = arith.constant 0 : index
      %19 = vector.load %arg3[%c0_11, %c0_12] : memref<4x2xf32, #tpu.memory_space<vmem>>, vector<4x2xf32>
      %c0_13 = arith.constant 0 : index
      %c0_14 = arith.constant 0 : index
      %20 = vector.load %arg4[%c0_13, %c0_14] : memref<1x2xf32, #tpu.memory_space<vmem>>, vector<1x2xf32>
      %c0_15 = arith.constant 0 : index
      %c0_16 = arith.constant 0 : index
      %21 = vector.load %arg5[%c0_15, %c0_16] : memref<2x4xf32, #tpu.memory_space<vmem>>, vector<2x4xf32>
      %c0_17 = arith.constant 0 : index
      %c0_18 = arith.constant 0 : index
      %22 = vector.load %arg6[%c0_17, %c0_18] : memref<1x4xf32, #tpu.memory_space<vmem>>, vector<1x4xf32>
      %cst_19 = arith.constant dense<0.000000e+00> : vector<2x2xf32>
      %23 = tpu.matmul %18, %19, %cst_19 {dimension_numbers = #tpu.dot_dimension_numbers<[1], [0], [0], [1], [0, 0, 1, 1], [], []>} : vector<2x4xf32>, vector<4x2xf32>, vector<2x2xf32> -> vector<2x2xf32>
      %24 = vector.broadcast %20 : vector<1x2xf32> to vector<2x2xf32>
      %25 = arith.addf %23, %24 : vector<2x2xf32>
      %cst_20 = arith.constant 0.000000e+00 : f32
      %26 = vector.broadcast %cst_20 : f32 to vector<2x2xf32>
      %27 = arith.maximumf %25, %26 : vector<2x2xf32>
      %cst_21 = arith.constant dense<0.000000e+00> : vector<2x4xf32>
      %28 = tpu.matmul %27, %21, %cst_21 {dimension_numbers = #tpu.dot_dimension_numbers<[1], [0], [0], [1], [0, 0, 1, 1], [], []>} : vector<2x2xf32>, vector<2x4xf32>, vector<2x4xf32> -> vector<2x4xf32>
      %29 = vector.broadcast %22 : vector<1x4xf32> to vector<2x4xf32>
      %30 = arith.addf %28, %29 : vector<2x4xf32>
      %31 = vector.extract_strided_slice %30 {offsets = [0, 0], sizes = [1, 4], strides = [1, 1]} : vector<2x4xf32> to vector<1x4xf32>
      %32 = vector.extract_strided_slice %30 {offsets = [1, 0], sizes = [1, 4], strides = [1, 1]} : vector<2x4xf32> to vector<1x4xf32>
      %33 = arith.addf %31, %32 : vector<1x4xf32>
      %34 = arith.negf %33 : vector<1x4xf32>
      %35 = math.exp %34 : vector<1x4xf32>
      %cst_22 = arith.constant 1.000000e+00 : f32
      %36 = vector.broadcast %cst_22 : f32 to vector<1x4xf32>
      %37 = arith.addf %36, %35 : vector<1x4xf32>
      %38 = arith.divf %36, %37 : vector<1x4xf32>
      %39 = vector.shape_cast %38 : vector<1x4xf32> to vector<1x1x4xf32>
      %c0_23 = arith.constant 0 : index
      %c0_24 = arith.constant 0 : index
      %c0_25 = arith.constant 0 : index
      %40 = vector.load %arg7[%c0_23, %c0_24, %c0_25] : memref<1x1x4xf32, #tpu.memory_space<vmem>>, vector<1x1x4xf32>
      tpu.vector_store %arg7[%c0_23, %c0_24, %c0_25], %39 {strides = array<i32>} : memref<1x1x4xf32, #tpu.memory_space<vmem>>, vector<1x1x4xf32>,
    } else {
    }
    return
  }
  func.func @transform_0(%arg0: i32, %arg1: i32) -> (i32, i32, i32) {
    %c0_i32 = arith.constant 0 : i32
    %c0_i32_0 = arith.constant 0 : i32
    return %arg0, %c0_i32, %arg1 : i32, i32, i32
  }
  func.func @transform_1(%arg0: i32, %arg1: i32) -> (i32, i32) {
    %c0_i32 = arith.constant 0 : i32
    %c0_i32_0 = arith.constant 0 : i32
    %c0_i32_1 = arith.constant 0 : i32
    return %c0_i32, %c0_i32_0 : i32, i32
  }
  func.func @transform_2(%arg0: i32, %arg1: i32) -> (i32, i32) {
    %c0_i32 = arith.constant 0 : i32
    %c0_i32_0 = arith.constant 0 : i32
    %c0_i32_1 = arith.constant 0 : i32
    return %c0_i32, %c0_i32_0 : i32, i32
  }
  func.func @transform_3(%arg0: i32, %arg1: i32) -> (i32, i32) {
    %c0_i32 = arith.constant 0 : i32
    %c0_i32_0 = arith.constant 0 : i32
    %c0_i32_1 = arith.constant 0 : i32
    return %c0_i32, %c0_i32_0 : i32, i32
  }
  func.func @transform_4(%arg0: i32, %arg1: i32) -> (i32, i32) {
    %c0_i32 = arith.constant 0 : i32
    %c0_i32_0 = arith.constant 0 : i32
    %c0_i32_1 = arith.constant 0 : i32
    return %c0_i32, %c0_i32_0 : i32, i32
  }
  func.func @transform_5(%arg0: i32, %arg1: i32) -> (i32, i32, i32) {
    %c0_i32 = arith.constant 0 : i32
    %c0_i32_0 = arith.constant 0 : i32
    %c0_i32_1 = arith.constant 0 : i32
    return %arg0, %c0_i32, %c0_i32_0 : i32, i32, i32
  }
}

</mosaic_0001>

<bundles_post_ra>
// kernel: tpu_custom_call.1
= control target key start
LH: loop header
LB: loop body
LE: loop exit
PB: predicated region body
PF: predicated region fallthrough
CT: control target
= control target key end

     0   :  { %10 = vsyncpa [#allocation4], 0  ;;  %s1009_s0 = inlined_call_operand.hbm [shape: f32[2,4,256], index: 0, kind: input, shape index: {}]   ;;  %s1010_s1 = inlined_call_operand.vmem [shape: f32[4,2], index: 1, kind: input, shape index: {}]   ;;  %s1011_s2 = inlined_call_operand.vmem [shape: f32[1,2], index: 2, kind: input, shape index: {}]   ;;  %s1012_s3 = inlined_call_operand.vmem [shape: f32[2,4], index: 3, kind: input, shape index: {}]   ;;  %s1013_s4 = inlined_call_operand.vmem [shape: f32[1,4], index: 4, kind: input, shape index: {}]   ;;  %s1014_s5 = inlined_call_operand.hbm [shape: f32[2,1,4], index: 5, kind: output, shape index: {}]  }
   0x1   :  { %12 = vsyncpa [#allocation4 + $0x1], 0 }
   0x2   :  { %13 = vsyncpa [#allocation5], 0 }
   0x3   :  { %15 = vsyncpa [#allocation5 + $0x1], 0  ;;  %s848_s18 = smov 0   ;;  %s850_s19 = smov 0  }
   0x4   :  { %s852_s20 = smov 0   ;;  %s854_s21 = smov 0  }
   0x5   :  { %s856_s22 = smov 0   ;;  %s858_s23 = smov 0  }
   0x6 LB: > { %s601_s24 = sadd.s32 4294967295, %s812_s23   ;;  %s602_s25 = sadd.s32 4294967294, %s812_s23   ;;  %s812_s23 = sphi %s858_s23, %s21_s23   ;;  %s808_s22 = sphi %s856_s22, %s1026_s22   ;;  %s804_s21 = sphi %s854_s21, %s1025_s21   ;;  %s800_s20 = sphi %s852_s20, %s1024_s20   ;;  %s796_s19 = sphi %s850_s19, %s1023_s19   ;;  %s792_s18 = sphi %s848_s18, %s1022_s18  }
   0x7   : > { %s33_s26 = sadd.s32 1, %s808_s22  ;;  %s42_s27 = sadd.s32 1, %s800_s20 }
   0x8   : > { %p35_p0 = scmp.ge.s32.totalorder %s33_s26, 2  ;;  %p49_p1 = scmp.ne.s32.totalorder %s800_s20, %s796_s19 }
   0x9   : > { %p50_p2 = scmp.eq.s32.totalorder %s812_s23, 0  ;;  %p55_p3 = scmp.ne.s32.totalorder %s796_s19, %s792_s18 }
   0xa   : > { %s1028_s26 = smov (%p35_p0, %s33_s26), 0  ;;  %p56_p5 = scmp.eq.s32.totalorder %s601_s24, 0 }
   0xb   : > { %p889_p4 = por %p50_p2, %p49_p1  ;;  %s37_s29 = ssub.s32 %s808_s22, %s1028_s26 }
   0xc   : > { %p163_p6 = scmp.eq.s32.totalorder %s601_s24, 1  ;;  %p40_p7 = scmp.eq.s32.totalorder %s37_s29, 0 }
   0xd   : > { %p895_p8 = por %p56_p5, %p55_p3  ;;  %p169_p10 = scmp.eq.s32.totalorder %s602_s25, 1 }
   0xe   : > { %p899_p9 = por %p163_p6, %p49_p1  ;;  %p647_p13 = scmp.lt.s32.totalorder %s812_s23, 2 }
   0xf   : > { %s904_s7 = scalar_select %p40_p7, %s800_s20, %s42_s27  }
  0x10   : > { %p906_p11 = por %p169_p10, %p55_p3  ;;  %s201_s9 = sand.u32 1, %s800_s20  }
  0x11   : > { %s605_s10 = sshll.u32 %s201_s9, 3  ;;  %s620_s11 = sshll.u32 %s808_s22, 7 }
  0x12   : > { %s1018_s8 = scalar_select %p906_p11, 1, 0 }
  0x13   : > { %s213_s14 = scalar_lea.hbm %s1009_s0, %s620_s11  ;;  %s205_s15 = scalar_lea.vmem [#allocation3], %s605_s10 }
  0x14   : > { %s215_s16 = sshll.u32 %s205_s15, 4  ;;  %p919_p0 = pnand %p647_p13, %p889_p4  ;;  %s216_s16 = int_to_ptr.vmem [resolvable:$true] %s215_s16 }
  0x15   : > { %p608_p1 = scmp.ge.s32.totalorder %s812_s23, 1  ;;  %p220_p2 = scmp.lt.s32.totalorder %s812_s23, 3 }
  0x16   : > { %s202_s24 = scalar_lea.sflag [#allocation4], %s201_s9  ;;  %p706_p3 = pneg %p919_p0 }
  0x17   : > { %s717_s25 = scalar_lea.vmem %s216_s16, 128  ;;  %s814_s27 = smov [#allocation3]  }
  0x18   : > { %p718_p5 = scmp.ne.s32.totalorder %s216_s16, %s717_s25  ;;  %s722_s29 = sshll.u32 %s814_s27, 4  ;;  %s723_s29 = int_to_ptr.vmem [resolvable:$false] %s722_s29 }
  0x19   : > { %s724_s10 = scalar_lea.vmem %s723_s29, 256  ;;  %p725_p10 = scmp.lt.s32.totalorder %s216_s16, %s723_s29 }
  0x1a   : > { %p720_p6 = pnand %p718_p5, %p706_p3  ;;  %p726_p12 = scmp.lt.s32.totalorder %s724_s10, %s717_s25 }
  0x1c   : > { %p721_p7 = pneg %p720_p6  ;;  %p727_p4 = por %p726_p12, %p725_p10 }
  0x1e   : > { %p728_p13 = pnand %p727_p4, %p721_p7 }
  0x20   : > { %731 = shalt.err (!%p728_p13)
}
  0x21   : > { %642 = dma.hbm_to_vmem [thread:$0]  (!%p919_p0), %s213_s14, 128, %s216_s16, %s202_s24  }
  0x22   : > { %p221_p11 = pnand %p608_p1, %p220_p2 }
  0x23   : > { %s934_s28 = sand.u32 (!%p221_p11), 1, %s796_s19  }
  0x24   : > { %224 = sbr.rel (%p221_p11) target bundleno = 644 (0x284), region = 40  ;;  %s609_s9 = sshll.u32 (!%p221_p11), %s934_s28, 3 }
  0x25   : > { %s227_s11 = scalar_lea.sflag (!%p221_p11), [#allocation4], %s934_s28  ;;  %s230_s12 = scalar_lea.vmem (!%p221_p11), [#allocation3], %s609_s9 }
  0x29   : > { %783 = dma.done.wait (%p895_p8), %s227_s11, 128  }
  0x2a   : > { %785 = vsyncadd (%p895_p8), %s227_s11, 4294967168  ;;  %vm261_vm0 = vcmask 1043456   ;;  %v257_v0 = vld [vmem:[%s230_s12] sm:$0xff]  ;;  %v815_v9 = vmov 0.0   ;;  %vm816_vm1 = vmmov 0   ;;  %v277_v10 = vlaneseq  ;;  %s617_s27 = sshll.u32 %s804_s21, 4 }
  0x2b   : > { %v259_v1 = vcombine.high %v257_v0, %v257_v0  ;;  %v262_v2 = vsel %vm261_vm0, %v257_v0, 0.0  ;;  %v267_v4 = vsel %vm261_vm0, %v257_v0, -inf  ;;  %v327_v8 = vld [vmem:[%s1010_s1] sm:$0xf]  ;;  %625 = vmatprep.subr.mxu0 %v815_v9  ;;  %627 = vmatprep.mubr.msk.f32.mxu0 %vm816_vm1, %v815_v9  ;;  %vm284_vm2 = vcmask 24576   ;;  %s255_s29 = scalar_lea.vmem [#allocation6], %s934_s28  ;;  %s966_s12 = scalar_lea.hbm %s1014_s5, %s617_s27 }
  0x2c   : > { %626 = vmatpush3.msk.msra.mxu0 %vm261_vm0, %v327_v8  ;;  %630 = vmatprep.subr.mxu1 %v815_v9  ;;  %v278_v11 = vand.u32 127, %v277_v10  ;;  %v280_v12 = vshrl.u32 %v277_v10, 7  ;;  %vm337_vm4 = vcmask 31744   ;;  %v329_v21 = vld [vmem:[%s1012_s3] sm:$0x3]  ;;  %vm425_vm5 = vcmask 1041408  }
  0x2d   : > { %v263_v3 = vsel %vm261_vm0, %v259_v1, 0.0  ;;  %v268_v5 = vsel %vm261_vm0, %v259_v1, -inf  ;;  %632 = vmatprep.mubr.msk.f32.mxu1 %vm816_vm1, %v815_v9  ;;  %631 = vmatpush3.msk.msra.mxu1 %vm425_vm5, %v329_v21  ;;  %v610_v22 = vld [vmem:[%s1011_s2] ss:$0 sm:$0xff]  ;;  %vm421_vm6 = vcmask 15360   ;;  %s524_s10 = sshll.u32 %s255_s29, 4  ;;  %s525_s10 = int_to_ptr.vmem [resolvable:$true] %s524_s10 }
  0x2e   : > { %v264_v6 = vadd.f32 %v263_v3, %v262_v2  ;;  %v269_v7 = vmax.f32 %v267_v4, %v268_v5  ;;  %v281_v13 = vsub.s32 %v278_v11, %v280_v12  ;;  %vm324_vm3 = vcmp.lt.s32.totalorder %v280_v12, 1  ;;  %v613_v27 = vld [vmem:[%s1013_s4] ss:$0 sm:$0xff]  ;;  %s512_s13 = scalar_lea.sflag [#allocation5], %s934_s28  ;;  %s732_s14 = scalar_lea.vmem %s525_s10, 16 }
  0x2f   : > { %p733_p8 = scmp.ne.s32.totalorder %s525_s10, %s732_s14  ;;  %s817_s30 = smov [#allocation6]  }
  0x30   : > { %265 = vadd.xlane.f32.xlu0 %v264_v6  ;;  %s736_s15 = sshll.u32 %s817_s30, 4  ;;  %s737_s15 = int_to_ptr.vmem [resolvable:$false] %s736_s15 }
  0x31   : > { %p734_p11 = pnand %p733_p8, %p899_p9  ;;  %s738_s21 = scalar_lea.vmem %s737_s15, 32 }
  0x32   : > { %p739_p0 = scmp.lt.s32.totalorder %s525_s10, %s737_s15  ;;  %p740_p1 = scmp.lt.s32.totalorder %s738_s21, %s732_s14 }
  0x33   : > { %p735_p12 = pneg %p734_p11 }
  0x34   : > { %270 = vmax.xlane.f32.xlu0 %v269_v7  ;;  %p741_p2 = por %p740_p1, %p739_p0 }
  0x36   : > { %p742_p3 = pnand %p741_p2, %p735_p12 }
  0xb9   : > { %v266_v14 = vpop.xlane.xlu0 %265 }
  0xba   : > { %v282_v15 = vrot.slane %v266_v14, %v281_v13 }
  0xbc   : > { %285 = vst.msk [vmem:[#allocation2] sm:$0x1] %vm284_vm2, %v282_v15 }
  0xbd   : > { %v271_v16 = vpop.xlane.xlu0 %270 }
  0xbe   : > { %v290_v17 = vrot.slane %v271_v16, %v281_v13 }
  0xc0   : > { %292 = vst.msk [vmem:[#allocation2 + $0x1] sm:$0x1] %vm284_vm2, %v290_v17 }
  0xc7   : > { %v321_v18 = vld [vmem:[#allocation2] sm:$0x3] }
  0xc8   : > { %v325_v19 = vmul.f32 0.00390625, %v321_v18 }
  0xca   : > { %v326_v20 = vsel %vm324_vm3, %v325_v19, %v321_v18 }
  0xcb   : > { %628 = vmatmul.mubr.msk.f32.vlgmr.msra.gmra.mxu0 %vm337_vm4, %v326_v20 }
 0x18b   : > { %v410_v23 = vpop.f32.mrf.mxu0 }
 0x18c   : > { %v411_v24 = vadd.f32 %v610_v22, %v410_v23 }
 0x18d   : > { %v629_v25 = vpop.f32.mrf.mxu0 }
 0x18e   : > { %v414_v26 = vmax.f32 %v411_v24, 0.0 }
 0x190   : > { %633 = vmatmul.mubr.msk.f32.vlgmr.msra.gmra.mxu1 %vm421_vm6, %v414_v26 }
 0x250   : > { %v495_v28 = vpop.f32.mrf.mxu1 }
 0x251   : > { %v496_v29 = vadd.f32 %v613_v27, %v495_v28 }
 0x252   : > { %v634_v30 = vpop.f32.mrf.mxu1 }
 0x253   : > { %v500_v31 = vrot.slane %v496_v29, 1 }
 0x255   : > { %v502_v32 = vadd.f32 %v500_v31, %v496_v29 }
 0x257   : > { %v616_v33 = vmul.f32 -1.442695, %v502_v32 }
 0x259   : > { %700 = vpow2.f32 %v616_v33 }
 0x266   : > { %v701_v34 = vpop.eup %700 }
 0x267   : > { %v506_v35 = vadd.f32 1.0, %v701_v34 }
 0x269   : > { %702 = vrcp.f32 %v506_v35 }
 0x276   : > { %v703_v36 = vpop.eup %702 }
 0x277   : > { %510 = vst.msk [vmem:[%s255_s29] sm:$0x1] %vm284_vm2, %v703_v36 }
 0x278   : > { %745 = shalt.err (!%p742_p3)
}
 0x279   : > { %s746_s16 = scalar_lea.hbm %s966_s12, 16  ;;  %s750_s24 = scalar_lea.hbm %s1014_s5, 32 }
 0x27a   : > { %p747_p5 = scmp.ne.s32.totalorder %s966_s12, %s746_s16  ;;  %p751_p10 = scmp.lt.s32.totalorder %s966_s12, %s1014_s5 }
 0x27b   : > { %p752_p4 = scmp.lt.s32.totalorder %s750_s24, %s746_s16 }
 0x27c   : > { %p748_p6 = pnand %p747_p5, %p899_p9 }
 0x27d   : > { %p753_p13 = por %p752_p4, %p751_p10 }
 0x27e   : > { %p749_p7 = pneg %p748_p6 }
 0x280   : > { %p754_p8 = pnand %p753_p13, %p749_p7 }
 0x282   : > { %757 = shalt.err (!%p754_p8)
}
 0x283   : > { %637 = dma.vmem_to_hbm [thread:$0]  (%p899_p9), %s525_s10, 16, %s966_s12, %s512_s13  }
 0x284 PF: > { %s536_s29 = sand.u32 1, %s792_s18   ;;  %p1020_p11 = scmp.ne.s32.totalorder %s1018_s8, 0 }
 0x285   : > { %p1021_p12 = scmp.ge.s32.totalorder %s812_s23, 2  ;;  %s537_s9 = scalar_lea.sflag [#allocation5], %s536_s29 }
 0x287   : > { %p644_p0 = pnand %p1021_p12, %p1020_p11 }
 0x289   : > { %p645_p1 = pneg %p644_p0 }
 0x28b   : > { %787 = dma.done.wait (%p645_p1), %s537_s9, 16  }
 0x28c   : > { %789 = vsyncadd (%p645_p1), %s537_s9, 4294967280  ;;  %s21_s23 = sadd.s32 1, %s812_s23   ;;  %s1022_s18 = smov %s796_s19 }
 0x28d   : > { %p18_p2 = scmp.ge.s32.totalorder %s21_s23, 4   ;;  %s1023_s19 = smov %s800_s20 }
 0x28e   : > { %s1024_s20 = smov %s904_s7  ;;  %s1025_s21 = smov %s808_s22 }
 0x28f   : > { %s1026_s22 = smov %s1028_s26  ;;  %20 = sbr.rel (!%p18_p2) target bundleno = 6 (0x6), region = 97 }
 0x294   :  { %541 = vsyncpa [#allocation4], 1 }
 0x295   :  { %543 = vsyncpa [#allocation4 + $0x1], 1 }
 0x296   :  { %544 = vsyncpa [#allocation5], 1 }
 0x297   :  { %546 = vsyncpa [#allocation5 + $0x1], 1 }

</bundles_post_ra>
